<compile_context>
chip_gen: v7x
topology: tpu7x:2x2x1
jax: 0.10.0
libtpu: 0.0.40
codegen_flags: <defaults>
</compile_context>

<pallas_src>
import functools
from typing import NamedTuple

import jax
import jax.numpy as jnp
import numpy as np
from jax.experimental import pallas as pl
from jax.experimental.pallas import tpu as pltpu

_LANE = 128


def _round_up(n, m=_LANE):
    return ((n + m - 1) // m) * m


def _vmem_budget_bytes(frac=0.85):
    """Generation-aware VMEM budget (~109 MiB on v5e/v6e, ~54 MiB on v7x)."""
    cap = 64 << 20  # conservative fallback = v7x per-TC physical VMEM
    try:
        info = pltpu.get_tpu_info()
        cap = int(getattr(info, "vmem_capacity_bytes", cap) or cap)
    except Exception:
        pass
    return int(cap * frac)


class GPRGNNParams(NamedTuple):
    """Pre-padded / pre-cast / pre-transposed operands.  Build once with
    gprgnn_prepare() and reuse for every forward call."""
    xT: jax.Array    # [Fp, Np] bf16   (x^T, lane dim = nodes)
    w1T: jax.Array   # [Hp, Fp] bf16   (W1^T)
    b1c: jax.Array   # [Hp, 1]  f32
    w2T: jax.Array   # [Cp, Hp] bf16   (W2^T)
    b2c: jax.Array   # [Cp, 1]  f32
    adjT: jax.Array  # [Np, Np]        (A_hat^T, padded; equals A_hat for undirected graphs)
    n_nodes: int
    n_classes: int


def gprgnn_prepare(x, w1, b1, w2, b2, adj_hat, *, adj_dtype=jnp.bfloat16):
    """x: [N,F] f32, w1: [F,H], b1: [1,H], w2: [H,C], b2: [1,C], adj_hat: [N,N]."""
    N, F_in = x.shape
    H = w1.shape[1]
    C = w2.shape[1]
    Np, Fp, Hp, Cp = (_round_up(v) for v in (N, F_in, H, C))

    def pad2(a, rows, cols):
        return jnp.pad(a, ((0, rows - a.shape[0]), (0, cols - a.shape[1])))

    return GPRGNNParams(
        xT=pad2(x.T, Fp, Np).astype(jnp.bfloat16),
        w1T=pad2(w1.T, Hp, Fp).astype(jnp.bfloat16),
        b1c=pad2(b1.reshape(-1, 1), Hp, 1).astype(jnp.float32),
        w2T=pad2(w2.T, Cp, Hp).astype(jnp.bfloat16),
        b2c=pad2(b2.reshape(-1, 1), Cp, 1).astype(jnp.float32),
        adjT=pad2(adj_hat.T, Np, Np).astype(adj_dtype),
        n_nodes=N,
        n_classes=C,
    )


# ---------------------------------------------------------------------------
# Resident path: whole A_hat^T lives in a VMEM scratch, DMA overlapped with MLP.
# ---------------------------------------------------------------------------
def _resident_kernel(temp_ref, xT_ref, w1T_ref, b1_ref, w2T_ref, b2_ref,
                     adjT_hbm, out_ref, adjT_vmem, adj_sem, *, K, num_classes):
    # Kick off the adjacency HBM->VMEM copy immediately so it overlaps with the
    # MLP matmuls; wait only right before the propagation loop.
    if K > 0:
        adj_copy = pltpu.make_async_copy(adjT_hbm, adjT_vmem, adj_sem)
        adj_copy.start()

    # MLP in transposed layout (lane dim = nodes everywhere).
    h = jnp.dot(w1T_ref[...], xT_ref[...],
                preferred_element_type=jnp.float32) + b1_ref[...]
    h = jnp.maximum(h, 0.0)
    z = jnp.dot(w2T_ref[...], h.astype(jnp.bfloat16),
                preferred_element_type=jnp.float32) + b2_ref[...]

    hidden = temp_ref[0] * z

    if K > 0:
        adj_copy.wait()
        for k in range(K):  # K is a small static Python int
            z = jnp.dot(z.astype(adjT_vmem.dtype), adjT_vmem[...],
                        preferred_element_type=jnp.float32)
            hidden = hidden + temp_ref[k + 1] * z

    # log_softmax over the (sublane) class axis, masking padded class rows.
    cls = jax.lax.broadcasted_iota(jnp.int32, hidden.shape, 0)
    masked = jnp.where(cls < num_classes, hidden, jnp.float32(-1e30))
    m = jnp.max(masked, axis=0, keepdims=True)
    shifted = masked - m
    lse = jnp.log(jnp.sum(jnp.exp(shifted), axis=0, keepdims=True))
    out_ref[...] = (shifted - lse).astype(out_ref.dtype)


def _forward_resident(p, temp, *, K, vmem_limit):
    Fp, Np = p.xT.shape
    Hp = p.w1T.shape[0]
    Cp = p.w2T.shape[0]
    adj_bytes = int(np.dtype(p.adjT.dtype).itemsize)

    cost = pl.CostEstimate(
        flops=2 * Np * (Fp * Hp + Hp * Cp) + K * 2 * Np * Np * Cp,
        transcendentals=Np * (Cp + 1),
        bytes_accessed=(Np * Fp * 2 + (Fp * Hp + Hp * Cp) * 2
                        + Np * Np * adj_bytes + Np * Cp * 4))

    vmem = pl.BlockSpec(memory_space=pltpu.MemorySpace.VMEM)
    smem = pl.BlockSpec(memory_space=pltpu.MemorySpace.SMEM)
    any_ = pl.BlockSpec(memory_space=pl.ANY)

    out = pl.pallas_call(
        functools.partial(_resident_kernel, K=K, num_classes=p.n_classes),
        out_shape=jax.ShapeDtypeStruct((Cp, Np), jnp.float32),
        in_specs=[smem, vmem, vmem, vmem, vmem, vmem, any_],
        out_specs=vmem,
        scratch_shapes=[pltpu.VMEM((Np, Np), p.adjT.dtype),
                        pltpu.SemaphoreType.DMA],
        compiler_params=pltpu.CompilerParams(vmem_limit_bytes=vmem_limit),
        cost_estimate=cost,
    )(temp.astype(jnp.float32), p.xT, p.w1T, p.b1c, p.w2T, p.b2c, p.adjT)
    return out[:p.n_classes, :p.n_nodes].T


# ---------------------------------------------------------------------------
# Streaming path: (K+1, node-column-tile) grid streams [Np, TN] blocks of
# A_hat^T; z / hidden live in persistent VMEM scratch.
# ---------------------------------------------------------------------------
def _streaming_kernel(temp_ref, xT_ref, w1T_ref, b1_ref, w2T_ref, b2_ref,
                      adjT_ref, out_ref, za_ref, zb_ref, hid_ref,
                      *, K, num_classes, col_tile):
    k = pl.program_id(0)
    j = pl.program_id(1)
    c0 = pl.multiple_of(j * col_tile, col_tile)
    cols = pl.ds(c0, col_tile)

    @pl.when(k == 0)
    def _mlp():
        h = jnp.dot(w1T_ref[...], xT_ref[...],
                    preferred_element_type=jnp.float32) + b1_ref[...]
        h = jnp.maximum(h, 0.0)
        z0 = jnp.dot(w2T_ref[...], h.astype(jnp.bfloat16),
                     preferred_element_type=jnp.float32) + b2_ref[...]
        za_ref[:, cols] = z0.astype(za_ref.dtype)
        hid_ref[:, cols] = temp_ref[0] * z0

    @pl.when(k > 0)
    def _propagate():
        def step(src_ref, dst_ref):
            z_new = jnp.dot(src_ref[...], adjT_ref[...],
                            preferred_element_type=jnp.float32)
            dst_ref[:, cols] = z_new.astype(dst_ref.dtype)
            hid_ref[:, cols] = hid_ref[:, cols] + temp_ref[k] * z_new

        # Ping-pong between the two z buffers; static buffer refs per branch.
        @pl.when(k % 2 == 1)
        def _odd():
            step(za_ref, zb_ref)

        @pl.when(k % 2 == 0)
        def _even():
            step(zb_ref, za_ref)

    @pl.when(k == K)
    def _epilogue():
        hid = hid_ref[:, cols]
        cls = jax.lax.broadcasted_iota(jnp.int32, hid.shape, 0)
        masked = jnp.where(cls < num_classes, hid, jnp.float32(-1e30))
        m = jnp.max(masked, axis=0, keepdims=True)
        shifted = masked - m
        lse = jnp.log(jnp.sum(jnp.exp(shifted), axis=0, keepdims=True))
        out_ref[...] = (shifted - lse).astype(out_ref.dtype)


def _pick_col_tile(Np, Cp, Fp, Hp, adj_bytes, budget):
    fixed = (3 * Cp * Np * 4                 # za / zb / hid scratch (f32 bound)
             + 2 * (Fp * Hp + Cp * Hp) * 2   # weights (double buffered)
             + (Hp + Cp) * _LANE * 4)        # biases (lane padded)
    for tn in (1024, 512, 256, 128):
        if Np % tn:
            continue
        per = (3 * Np * tn * adj_bytes       # adjT blocks (triple buffered)
               + 2 * Fp * tn * 2             # xT blocks
               + 2 * Cp * tn * 4             # out blocks
               + (Hp + 4 * Cp) * tn * 4)     # in-kernel intermediates headroom
        if fixed + per + (4 << 20) <= budget:
            return tn
    return 128


def _forward_streaming(p, temp, *, K, budget):
    Fp, Np = p.xT.shape
    Hp = p.w1T.shape[0]
    Cp = p.w2T.shape[0]
    adj_bytes = int(np.dtype(p.adjT.dtype).itemsize)

    TN = _pick_col_tile(Np, Cp, Fp, Hp, adj_bytes, budget)
    n_tiles = Np // TN

    def adj_idx(k, j, temp_sref):
        # A_hat^T is not needed at k == 0; pin to block 0 so no re-fetch happens.
        return (0, jnp.where(k == 0, 0, j))

    def x_idx(k, j, temp_sref):
        # x^T is only needed at k == 0; pin to block 0 afterwards.
        return (0, jnp.where(k == 0, j, 0))

    try:  # multi-buffer the big adjacency DMA; fall back if unsupported.
        adj_spec = pl.BlockSpec((Np, TN), adj_idx, pipeline_mode=pl.Buffered(3))
    except TypeError:
        adj_spec = pl.BlockSpec((Np, TN), adj_idx)

    cost = pl.CostEstimate(
        flops=2 * Np * (Fp * Hp + Hp * Cp) + K * 2 * Np * Np * Cp,
        transcendentals=Np * (Cp + 1),
        bytes_accessed=(Np * Fp * 2 + (Fp * Hp + Hp * Cp) * 2
                        + max(K, 1) * Np * Np * adj_bytes + Np * Cp * 4))

    grid_spec = pltpu.PrefetchScalarGridSpec(
        num_scalar_prefetch=1,
        grid=(K + 1, n_tiles),
        in_specs=[
            pl.BlockSpec((Fp, TN), x_idx),
            pl.BlockSpec((Hp, Fp), lambda k, j, t: (0, 0)),
            pl.BlockSpec((Hp, 1), lambda k, j, t: (0, 0)),
            pl.BlockSpec((Cp, Hp), lambda k, j, t: (0, 0)),
            pl.BlockSpec((Cp, 1), lambda k, j, t: (0, 0)),
            adj_spec,
        ],
        out_specs=pl.BlockSpec((Cp, TN), lambda k, j, t: (0, j)),
        scratch_shapes=[pltpu.VMEM((Cp, Np), p.adjT.dtype),
                        pltpu.VMEM((Cp, Np), p.adjT.dtype),
                        pltpu.VMEM((Cp, Np), jnp.float32)],
    )

    out = pl.pallas_call(
        functools.partial(_streaming_kernel, K=K, num_classes=p.n_classes,
                          col_tile=TN),
        out_shape=jax.ShapeDtypeStruct((Cp, Np), jnp.float32),
        grid_spec=grid_spec,
        compiler_params=pltpu.CompilerParams(
            dimension_semantics=("arbitrary", "arbitrary"),
            vmem_limit_bytes=budget),
        cost_estimate=cost,
    )(temp.astype(jnp.float32), p.xT, p.w1T, p.b1c, p.w2T, p.b2c, p.adjT)
    return out[:p.n_classes, :p.n_nodes].T


def gprgnn_forward(params, temp, *, K, force_streaming=False):
    """Returns [N, num_classes] log-probabilities."""
    budget = _vmem_budget_bytes()
    Fp, Np = params.xT.shape
    Hp = params.w1T.shape[0]
    Cp = params.w2T.shape[0]
    adj_bytes = int(np.dtype(params.adjT.dtype).itemsize)
    resident_est = (Np * Np * adj_bytes            # adjacency in VMEM
                    + Np * Fp * 2                  # x^T
                    + (Fp * Hp + Cp * Hp) * 2      # weights
                    + (Hp + Cp) * _LANE * 4        # biases (lane padded)
                    + Np * Cp * 4                  # output
                    + (Hp + 2 * Cp) * Np * 4       # h / z / hidden f32
                    + (Hp + Cp) * Np * 2)          # bf16 operand copies
    if force_streaming or int(resident_est * 1.25) + (4 << 20) > budget:
        return _forward_streaming(params, temp, K=K, budget=budget)
    return _forward_resident(params, temp, K=K, vmem_limit=budget)


# ---------------------------------------------------------------------------
# Graph / parameter helpers and a pure-JAX reference.
# ---------------------------------------------------------------------------
def build_normalized_adjacency(edge_index, num_nodes):
    """Dense gcn_norm with add_remaining_self_loops semantics."""
    src, dst = edge_index[0], edge_index[1]
    A = jnp.zeros((num_nodes, num_nodes), jnp.float32)
    A = A.at[dst, src].add(1.0)
    diag = jnp.diagonal(A)
    A = A + jnp.diag(jnp.where(diag == 0.0, 1.0, 0.0))
    deg = jnp.sum(A, axis=1)
    dinv = jnp.where(deg > 0, 1.0 / jnp.sqrt(deg), 0.0)
    return dinv[:, None] * A * dinv[None, :]


def ppr_temp(K, alpha):
    temp = alpha * (1.0 - alpha) ** np.arange(K + 1)
    temp[-1] = (1.0 - alpha) ** K
    return jnp.asarray(temp, jnp.float32)


def _reference_forward(x, w1, b1, w2, b2, adj, temp, K):
    """Pure-JAX reference mirroring the kernel's bf16/f32 numerics."""
    h = jnp.dot(x.astype(jnp.bfloat16), w1.astype(jnp.bfloat16),
                preferred_element_type=jnp.float32) + b1
    h = jnp.maximum(h, 0.0)
    z = jnp.dot(h.astype(jnp.bfloat16), w2.astype(jnp.bfloat16),
                preferred_element_type=jnp.float32) + b2
    adjb = adj.astype(jnp.bfloat16)
    hidden = temp[0] * z
    for k in range(K):
        z = jnp.dot(adjb, z.astype(jnp.bfloat16),
                    preferred_element_type=jnp.float32)
        hidden = hidden + temp[k + 1] * z
    return jax.nn.log_softmax(hidden, axis=1)


if __name__ == "__main__":
    K = 4
    ALPHA = 0.1
    HID = 32

    def make_problem(seed, n_nodes, n_feat, n_classes, n_edges):
        key = jax.random.PRNGKey(seed)
        kx, ke, kw1, kb1, kw2, kb2 = jax.random.split(key, 6)
        x = jax.random.normal(kx, (n_nodes, n_feat), jnp.float32)
        src = jax.random.randint(ke, (n_edges,), 0, n_nodes)
        dst = jax.random.randint(jax.random.fold_in(ke, 1), (n_edges,), 0, n_nodes)
        edge_index = jnp.stack([jnp.concatenate([src, dst]),
                                jnp.concatenate([dst, src])], axis=0)
        w1 = jax.random.normal(kw1, (n_feat, HID), jnp.float32) / np.sqrt(n_feat)
        b1 = jax.random.normal(kb1, (1, HID), jnp.float32) * 0.01
        w2 = jax.random.normal(kw2, (HID, n_classes), jnp.float32) / np.sqrt(HID)
        b2 = jax.random.normal(kb2, (1, n_classes), jnp.float32) * 0.01
        adj = build_normalized_adjacency(edge_index, n_nodes)
        return x, w1, b1, w2, b2, adj

    temp = ppr_temp(K, ALPHA)

    # ---- Test 1: small graph, resident (DMA-overlapped) path ----
    x, w1, b1, w2, b2, adj = make_problem(0, 64, 32, 8, 128)
    params = gprgnn_prepare(x, w1, b1, w2, b2, adj)   # built once, reused
    out = jax.block_until_ready(gprgnn_forward(params, temp, K=K))
    assert out.shape == (64, 8)
    assert bool(jnp.all(jnp.abs(jnp.sum(jnp.exp(out), axis=1) - 1.0) < 1e-4))
    ref = _reference_forward(x, w1, b1, w2, b2, adj, temp, K)
    assert bool(jnp.max(jnp.abs(out - ref)) < 2e-2), "resident path mismatch"

    # ---- Test 2: multi-tile graph, forced streaming (K, col-tile) path ----
    x, w1, b1, w2, b2, adj = make_problem(1, 300, 48, 6, 900)
    params_s = gprgnn_prepare(x, w1, b1, w2, b2, adj)
    out_s = jax.block_until_ready(
        gprgnn_forward(params_s, temp, K=K, force_streaming=True))
    assert out_s.shape == (300, 6)
    assert bool(jnp.all(jnp.abs(jnp.sum(jnp.exp(out_s), axis=1) - 1.0) < 1e-4))
    ref_s = _reference_forward(x, w1, b1, w2, b2, adj, temp, K)
    assert bool(jnp.max(jnp.abs(out_s - ref_s)) < 2e-2), "streaming path mismatch"

    print("KERNEL_OK")
</pallas_src>

<mosaic_0001>
module attributes {stable_mosaic.version = 11 : i64} {
  func.func @_resident_kernel(%arg0: memref<5xf32, #tpu.memory_space<smem>>, %arg1: memref<128x128xbf16, #tpu.memory_space<vmem>>, %arg2: memref<128x128xbf16, #tpu.memory_space<vmem>>, %arg3: memref<128x1xf32, #tpu.memory_space<vmem>>, %arg4: memref<128x128xbf16, #tpu.memory_space<vmem>>, %arg5: memref<128x1xf32, #tpu.memory_space<vmem>>, %arg6: memref<128x128xbf16, #tpu.memory_space<any>>, %arg7: memref<128x128xf32, #tpu.memory_space<vmem>>, %arg8: memref<128x128xbf16, #tpu.memory_space<vmem>>, %arg9: memref<!tpu.dma_semaphore, #tpu.memory_space<semaphore_mem>>) attributes {dimension_semantics = [], scalar_prefetch = 0 : i64, scratch_operands = 2 : i64, tpu.core_type = #tpu.core_type<tc>} {
    tpu.enqueue_dma source(%arg6 : memref<128x128xbf16, #tpu.memory_space<any>>) target(%arg8 : memref<128x128xbf16, #tpu.memory_space<vmem>>) target_semaphore(%arg9 : memref<!tpu.dma_semaphore, #tpu.memory_space<semaphore_mem>>)
    %c0 = arith.constant 0 : index
    %c0_0 = arith.constant 0 : index
    %0 = vector.load %arg2[%c0, %c0_0] : memref<128x128xbf16, #tpu.memory_space<vmem>>, vector<128x128xbf16>
    %c0_1 = arith.constant 0 : index
    %c0_2 = arith.constant 0 : index
    %1 = vector.load %arg1[%c0_1, %c0_2] : memref<128x128xbf16, #tpu.memory_space<vmem>>, vector<128x128xbf16>
    %cst = arith.constant dense<0.000000e+00> : vector<128x128xf32>
    %2 = tpu.matmul %0, %1, %cst {dimension_numbers = #tpu.dot_dimension_numbers<[1], [0], [0], [1], [0, 0, 1, 1], [], []>} : vector<128x128xbf16>, vector<128x128xbf16>, vector<128x128xf32> -> vector<128x128xf32>
    %c0_3 = arith.constant 0 : index
    %c0_4 = arith.constant 0 : index
    %3 = vector.load %arg3[%c0_3, %c0_4] : memref<128x1xf32, #tpu.memory_space<vmem>>, vector<128x1xf32>
    %4 = vector.broadcast %3 : vector<128x1xf32> to vector<128x128xf32>
    %5 = arith.addf %2, %4 : vector<128x128xf32>
    %cst_5 = arith.constant 0.000000e+00 : f32
    %6 = vector.broadcast %cst_5 : f32 to vector<128x128xf32>
    %7 = arith.maximumf %5, %6 : vector<128x128xf32>
    %c0_6 = arith.constant 0 : index
    %c0_7 = arith.constant 0 : index
    %8 = vector.load %arg4[%c0_6, %c0_7] : memref<128x128xbf16, #tpu.memory_space<vmem>>, vector<128x128xbf16>
    %9 = arith.truncf %7 : vector<128x128xf32> to vector<128x128xbf16>
    %cst_8 = arith.constant dense<0.000000e+00> : vector<128x128xf32>
    %10 = tpu.matmul %8, %9, %cst_8 {dimension_numbers = #tpu.dot_dimension_numbers<[1], [0], [0], [1], [0, 0, 1, 1], [], []>} : vector<128x128xbf16>, vector<128x128xbf16>, vector<128x128xf32> -> vector<128x128xf32>
    %c0_9 = arith.constant 0 : index
    %c0_10 = arith.constant 0 : index
    %11 = vector.load %arg5[%c0_9, %c0_10] : memref<128x1xf32, #tpu.memory_space<vmem>>, vector<128x1xf32>
    %12 = vector.broadcast %11 : vector<128x1xf32> to vector<128x128xf32>
    %13 = arith.addf %10, %12 : vector<128x128xf32>
    %c0_11 = arith.constant 0 : index
    %14 = memref.load %arg0[%c0_11] : memref<5xf32, #tpu.memory_space<smem>>
    %15 = vector.broadcast %14 : f32 to vector<128x128xf32>
    %16 = arith.mulf %15, %13 : vector<128x128xf32>
    tpu.wait_dma2 semaphore(%arg9 : memref<!tpu.dma_semaphore, #tpu.memory_space<semaphore_mem>>) src(%arg6 : memref<128x128xbf16, #tpu.memory_space<any>>) dst(%arg8 : memref<128x128xbf16, #tpu.memory_space<vmem>>)
    %17 = arith.truncf %13 : vector<128x128xf32> to vector<128x128xbf16>
    %c0_12 = arith.constant 0 : index
    %c0_13 = arith.constant 0 : index
    %18 = vector.load %arg8[%c0_12, %c0_13] : memref<128x128xbf16, #tpu.memory_space<vmem>>, vector<128x128xbf16>
    %cst_14 = arith.constant dense<0.000000e+00> : vector<128x128xf32>
    %19 = tpu.matmul %17, %18, %cst_14 {dimension_numbers = #tpu.dot_dimension_numbers<[1], [0], [0], [1], [0, 0, 1, 1], [], []>} : vector<128x128xbf16>, vector<128x128xbf16>, vector<128x128xf32> -> vector<128x128xf32>
    %c1 = arith.constant 1 : index
    %20 = memref.load %arg0[%c1] : memref<5xf32, #tpu.memory_space<smem>>
    %21 = vector.broadcast %20 : f32 to vector<128x128xf32>
    %22 = arith.mulf %21, %19 : vector<128x128xf32>
    %23 = arith.addf %16, %22 : vector<128x128xf32>
    %24 = arith.truncf %19 : vector<128x128xf32> to vector<128x128xbf16>
    %c0_15 = arith.constant 0 : index
    %c0_16 = arith.constant 0 : index
    %25 = vector.load %arg8[%c0_15, %c0_16] : memref<128x128xbf16, #tpu.memory_space<vmem>>, vector<128x128xbf16>
    %cst_17 = arith.constant dense<0.000000e+00> : vector<128x128xf32>
    %26 = tpu.matmul %24, %25, %cst_17 {dimension_numbers = #tpu.dot_dimension_numbers<[1], [0], [0], [1], [0, 0, 1, 1], [], []>} : vector<128x128xbf16>, vector<128x128xbf16>, vector<128x128xf32> -> vector<128x128xf32>
    %c2 = arith.constant 2 : index
    %27 = memref.load %arg0[%c2] : memref<5xf32, #tpu.memory_space<smem>>
    %28 = vector.broadcast %27 : f32 to vector<128x128xf32>
    %29 = arith.mulf %28, %26 : vector<128x128xf32>
    %30 = arith.addf %23, %29 : vector<128x128xf32>
    %31 = arith.truncf %26 : vector<128x128xf32> to vector<128x128xbf16>
    %c0_18 = arith.constant 0 : index
    %c0_19 = arith.constant 0 : index
    %32 = vector.load %arg8[%c0_18, %c0_19] : memref<128x128xbf16, #tpu.memory_space<vmem>>, vector<128x128xbf16>
    %cst_20 = arith.constant dense<0.000000e+00> : vector<128x128xf32>
    %33 = tpu.matmul %31, %32, %cst_20 {dimension_numbers = #tpu.dot_dimension_numbers<[1], [0], [0], [1], [0, 0, 1, 1], [], []>} : vector<128x128xbf16>, vector<128x128xbf16>, vector<128x128xf32> -> vector<128x128xf32>
    %c3 = arith.constant 3 : index
    %34 = memref.load %arg0[%c3] : memref<5xf32, #tpu.memory_space<smem>>
    %35 = vector.broadcast %34 : f32 to vector<128x128xf32>
    %36 = arith.mulf %35, %33 : vector<128x128xf32>
    %37 = arith.addf %30, %36 : vector<128x128xf32>
    %38 = arith.truncf %33 : vector<128x128xf32> to vector<128x128xbf16>
    %c0_21 = arith.constant 0 : index
    %c0_22 = arith.constant 0 : index
    %39 = vector.load %arg8[%c0_21, %c0_22] : memref<128x128xbf16, #tpu.memory_space<vmem>>, vector<128x128xbf16>
    %cst_23 = arith.constant dense<0.000000e+00> : vector<128x128xf32>
    %40 = tpu.matmul %38, %39, %cst_23 {dimension_numbers = #tpu.dot_dimension_numbers<[1], [0], [0], [1], [0, 0, 1, 1], [], []>} : vector<128x128xbf16>, vector<128x128xbf16>, vector<128x128xf32> -> vector<128x128xf32>
    %c4 = arith.constant 4 : index
    %41 = memref.load %arg0[%c4] : memref<5xf32, #tpu.memory_space<smem>>
    %42 = vector.broadcast %41 : f32 to vector<128x128xf32>
    %43 = arith.mulf %42, %40 : vector<128x128xf32>
    %44 = arith.addf %37, %43 : vector<128x128xf32>
    %45 = tpu.iota {dimensions = array<i32: 0>} : vector<128x128xi32>
    %c8_i32 = arith.constant 8 : i32
    %46 = vector.broadcast %c8_i32 : i32 to vector<128x128xi32>
    %47 = arith.cmpi slt, %45, %46 : vector<128x128xi32>
    %cst_24 = arith.constant -1.000000e+30 : f32
    %48 = vector.broadcast %cst_24 : f32 to vector<128x128xf32>
    %49 = arith.select %47, %44, %48 : vector<128x128xi1>, vector<128x128xf32>
    %cst_25 = arith.constant dense<0xFF800000> : vector<128xf32>
    %50 = vector.multi_reduction <maximumf>, %49, %cst_25 [0] : vector<128x128xf32> to vector<128xf32>
    %51 = vector.shape_cast %50 : vector<128xf32> to vector<1x128xf32>
    %52 = vector.broadcast %51 : vector<1x128xf32> to vector<128x128xf32>
    %53 = arith.subf %49, %52 : vector<128x128xf32>
    %54 = math.exp %53 : vector<128x128xf32>
    %cst_26 = arith.constant dense<0.000000e+00> : vector<128xf32>
    %55 = vector.multi_reduction <add>, %54, %cst_26 [0] : vector<128x128xf32> to vector<128xf32>
    %56 = vector.shape_cast %55 : vector<128xf32> to vector<1x128xf32>
    %57 = math.log %56 : vector<1x128xf32>
    %58 = vector.broadcast %57 : vector<1x128xf32> to vector<128x128xf32>
    %59 = arith.subf %53, %58 : vector<128x128xf32>
    %c0_27 = arith.constant 0 : index
    %c0_28 = arith.constant 0 : index
    %60 = vector.load %arg7[%c0_27, %c0_28] : memref<128x128xf32, #tpu.memory_space<vmem>>, vector<128x128xf32>
    tpu.vector_store %arg7[%c0_27, %c0_28], %59 {strides = array<i32>} : memref<128x128xf32, #tpu.memory_space<vmem>>, vector<128x128xf32>,
    return
  }
}

</mosaic_0001>

<bundles_post_ra>
// kernel: tpu_custom_call.1
= control target key start
LH: loop header
LB: loop body
LE: loop exit
PB: predicated region body
PF: predicated region fallthrough
CT: control target
= control target key end

     0   :  { %12 = vsyncpa [#allocation6], 0  ;;  %s2253_s0 = inlined_call_operand.vmem [shape: f32[5], index: 0, kind: input, shape index: {}]   ;;  %s2254_s1 = inlined_call_operand.vmem [shape: bf16[128,128], index: 1, kind: input, shape index: {}]   ;;  %s2255_s2 = inlined_call_operand.vmem [shape: bf16[128,128], index: 2, kind: input, shape index: {}]   ;;  %s2256_s3 = inlined_call_operand.vmem [shape: f32[128,1], index: 3, kind: input, shape index: {}]   ;;  %s2257_s4 = inlined_call_operand.vmem [shape: bf16[128,128], index: 4, kind: input, shape index: {}]   ;;  %s2258_s5 = inlined_call_operand.vmem [shape: f32[128,1], index: 5, kind: input, shape index: {}]   ;;  %s2259_s6 = inlined_call_operand.vmem [shape: bf16[128,128], index: 6, kind: input, shape index: {}]   ;;  %s2260_s7 = inlined_call_operand.hbm [shape: f32[128,128], index: 7, kind: output, shape index: {}]  }
   0x1   :  { %13 = vsyncpa [#allocation5], 0  ;;  %s20_s26 = sshll.u32 %s2253_s0, 4  ;;  %s21_s26 = int_to_ptr.vmem [resolvable:$true] %s20_s26 }
   0x2   :  { %s1841_s27 = scalar_lea.vmem %s21_s26, 16  ;;  %p1846_p1 = scmp.lt.s32.totalorder %s21_s26, %s21_s26 }
   0x3   :  { %p1842_p0 = scmp.ne.s32.totalorder %s21_s26, %s1841_s27  ;;  %p1847_p2 = scmp.lt.s32.totalorder %s1841_s27, %s1841_s27 }
   0x5   :  { %p1848_p3 = por %p1847_p2, %p1846_p1 }
   0x7   :  { %p1849_p4 = pnand %p1848_p3, %p1842_p0 }
   0x9   :  { %1852 = shalt.err (!%p1849_p4)
}
   0xa   :  { %s1881_s28 = smov [#allocation4]  }
   0xb   :  { %23 = dma.vmem_to_smem %s21_s26, 16, %s1881_s28, [#allocation6]  }
   0xc   :  { %1875 = dma.done.wait [#allocation6], 16  }
   0xd   :  { %1876 = vsyncadd [#allocation6], 4294967280 }
   0xe   :  { %37 = sfence }
   0xf   :  { %v1932_v0 = vld [vmem:[%s2259_s6] sm:$0xff]  ;;  %v1937_v1 = vld [vmem:[%s2259_s6 + $0x8] sm:$0xff]  ;;  %v1942_v2 = vld [vmem:[%s2259_s6 + $0x10] sm:$0xff] }
  0x10   :  { %v1947_v3 = vld [vmem:[%s2259_s6 + $0x18] sm:$0xff]  ;;  %v1952_v4 = vld [vmem:[%s2259_s6 + $0x20] sm:$0xff]  ;;  %v1957_v5 = vld [vmem:[%s2259_s6 + $0x28] sm:$0xff] }
  0x11   :  { %v1962_v6 = vld [vmem:[%s2259_s6 + $0x30] sm:$0xff]  ;;  %v1967_v7 = vld [vmem:[%s2259_s6 + $0x38] sm:$0xff] }
  0x12   :  { %94 = vsyncadd [#allocation3], 1024  ;;  %v1811_v8 = vld [vmem:[%s2254_s1] sm:$0xff]   ;;  %v1812_v9 = vld [vmem:[%s2254_s1 + $0x8] sm:$0xff]   ;;  %v1882_v10 = vmov 0   ;;  %s697_s26 = sld [smem:[#allocation4]] }
  0x13   :  { %1809 = vset.pattern.permute.xlu0 %v1882_v10  ;;  %1810 = vset.pattern.permute.xlu1 %v1882_v10  ;;  %v1813_v11 = vld [vmem:[%s2254_s1 + $0x10] sm:$0xff]   ;;  %v1814_v12 = vld [vmem:[%s2254_s1 + $0x18] sm:$0xff]   ;;  %v1819_v13 = vld [vmem:[%s2255_s2] sm:$0xff]  }
  0x14   :  { %1612 = vmatprep.subr.bf16.mxu0 %v1811_v8  ;;  %1628 = vmatprep.mubr.bf16.mxu0 %v1819_v13  ;;  %v1815_v14 = vld [vmem:[%s2254_s1 + $0x20] sm:$0xff]   ;;  %v129_v16 = vld [vmem:[%s2256_s3 + $0x10] sm:$0xff]  ;;  %v1816_v17 = vld [vmem:[%s2254_s1 + $0x28] sm:$0xff]  }
  0x15   :  { %1613 = vmatpush3.bf16.msra.mxu0 %v1811_v8  ;;  %v127_v15 = vld [vmem:[%s2256_s3] sm:$0xff]  ;;  %155 = vperm.xlu1 %1810, %v129_v16   ;;  %v128_v18 = vld [vmem:[%s2256_s3 + $0x8] sm:$0xff]  ;;  %v130_v19 = vld [vmem:[%s2256_s3 + $0x18] sm:$0xff] }
  0x16   :  { %1614 = vmatprep.subr.bf16.mxu0 %v1812_v9  ;;  %145 = vperm.xlu0 %1809, %v127_v15   ;;  %v131_v20 = vld [vmem:[%s2256_s3 + $0x20] sm:$0xff]  ;;  %v1817_v21 = vld [vmem:[%s2254_s1 + $0x30] sm:$0xff]   ;;  %v132_v22 = vld [vmem:[%s2256_s3 + $0x28] sm:$0xff] }
  0x17   :  { %v133_v23 = vld [vmem:[%s2256_s3 + $0x30] sm:$0xff]  ;;  %v1818_v24 = vld [vmem:[%s2254_s1 + $0x38] sm:$0xff]   ;;  %v135_v26 = vld [vmem:[%s2256_s3 + $0x40] sm:$0xff] }
  0x18   :  { %v134_v25 = vld [vmem:[%s2256_s3 + $0x38] sm:$0xff]  ;;  %v136_v27 = vld [vmem:[%s2256_s3 + $0x48] sm:$0xff]  ;;  %v1821_v29 = vld [vmem:[%s2255_s2 + $0x10] sm:$0xff]  }
  0x19   :  { %1615 = vmatpush3.bf16.msra.mxu0 %v1812_v9  ;;  %160 = vperm.xlu1 %1810, %v130_v19   ;;  %v1820_v28 = vld [vmem:[%s2255_s2 + $0x8] sm:$0xff]   ;;  %v137_v30 = vld [vmem:[%s2256_s3 + $0x50] sm:$0xff]  ;;  %v138_v31 = vld [vmem:[%s2256_s3 + $0x58] sm:$0xff] }
  0x1a   :  { %1616 = vmatprep.subr.bf16.mxu0 %v1813_v11  ;;  %150 = vperm.xlu0 %1809, %v128_v18   ;;  %v139_v32 = vld [vmem:[%s2256_s3 + $0x60] sm:$0xff]  ;;  %v140_v33 = vld [vmem:[%s2256_s3 + $0x68] sm:$0xff]  ;;  %v1822_v34 = vld [vmem:[%s2255_s2 + $0x18] sm:$0xff]  }
  0x1b   :  { %v1823_v35 = vld [vmem:[%s2255_s2 + $0x20] sm:$0xff]   ;;  %v141_v36 = vld [vmem:[%s2256_s3 + $0x70] sm:$0xff]  ;;  %v142_v37 = vld [vmem:[%s2256_s3 + $0x78] sm:$0xff] }
  0x1c   :  { %v456_v38 = vld [vmem:[%s2258_s5] sm:$0xff]  ;;  %v457_v39 = vld [vmem:[%s2258_s5 + $0x8] sm:$0xff]  ;;  %v1825_v41 = vld [vmem:[%s2255_s2 + $0x30] sm:$0xff]  }
  0x1d   :  { %1617 = vmatpush3.bf16.msra.mxu0 %v1813_v11  ;;  %170 = vperm.xlu1 %1810, %v132_v22   ;;  %v1824_v40 = vld [vmem:[%s2255_s2 + $0x28] sm:$0xff]   ;;  %v458_v42 = vld [vmem:[%s2258_s5 + $0x10] sm:$0xff]  ;;  %v459_v43 = vld [vmem:[%s2258_s5 + $0x18] sm:$0xff] }
  0x1e   :  { %1618 = vmatprep.subr.bf16.mxu0 %v1814_v12  ;;  %165 = vperm.xlu0 %1809, %v131_v20   ;;  %v460_v44 = vld [vmem:[%s2258_s5 + $0x20] sm:$0xff]  ;;  %v461_v45 = vld [vmem:[%s2258_s5 + $0x28] sm:$0xff]  ;;  %v1826_v46 = vld [vmem:[%s2255_s2 + $0x38] sm:$0xff]  }
  0x1f   :  { %v462_v47 = vld [vmem:[%s2258_s5 + $0x30] sm:$0xff]  ;;  %v463_v48 = vld [vmem:[%s2258_s5 + $0x38] sm:$0xff]  ;;  %v464_v49 = vld [vmem:[%s2258_s5 + $0x40] sm:$0xff] }
  0x20   :  { %v465_v50 = vld [vmem:[%s2258_s5 + $0x48] sm:$0xff]  ;;  %v466_v51 = vld [vmem:[%s2258_s5 + $0x50] sm:$0xff]  ;;  %v467_v52 = vld [vmem:[%s2258_s5 + $0x58] sm:$0xff] }
  0x21   :  { %1619 = vmatpush3.bf16.msra.mxu0 %v1814_v12  ;;  %180 = vperm.xlu1 %1810, %v134_v25   ;;  %v468_v53 = vld [vmem:[%s2258_s5 + $0x60] sm:$0xff]  ;;  %v469_v54 = vld [vmem:[%s2258_s5 + $0x68] sm:$0xff]  ;;  %v470_v55 = vld [vmem:[%s2258_s5 + $0x70] sm:$0xff] }
  0x22   :  { %1620 = vmatprep.subr.bf16.mxu0 %v1815_v14  ;;  %175 = vperm.xlu0 %1809, %v133_v23   ;;  %v471_v56 = vld [vmem:[%s2258_s5 + $0x78] sm:$0xff]  ;;  %v1827_v57 = vld [vmem:[%s2257_s4] sm:$0xff]  }
  0x23   :  { %1660 = vmatprep.mubr.bf16.mxu1 %v1827_v57 }
  0x25   :  { %1621 = vmatpush3.bf16.msra.mxu0 %v1815_v14  ;;  %190 = vperm.xlu1 %1810, %v136_v27  }
  0x26   :  { %1622 = vmatprep.subr.bf16.mxu0 %v1816_v17  ;;  %185 = vperm.xlu0 %1809, %v135_v26  }
  0x29   :  { %1623 = vmatpush3.bf16.msra.mxu0 %v1816_v17  ;;  %200 = vperm.xlu1 %1810, %v138_v31  }
  0x2a   :  { %1624 = vmatprep.subr.bf16.mxu0 %v1817_v21  ;;  %195 = vperm.xlu0 %1809, %v137_v30  }
  0x2d   :  { %1625 = vmatpush3.bf16.msra.mxu0 %v1817_v21  ;;  %210 = vperm.xlu1 %1810, %v140_v33  }
  0x2e   :  { %1626 = vmatprep.subr.bf16.mxu0 %v1818_v24  ;;  %205 = vperm.xlu0 %1809, %v139_v32  }
  0x31   :  { %1627 = vmatpush3.bf16.msra.mxu0 %v1818_v24  ;;  %220 = vperm.xlu1 %1810, %v142_v37  }
  0x32   :  { %215 = vperm.xlu0 %1809, %v141_v36   ;;  %1676 = vmatprep.subr.bf16.mxu0 %v1932_v0 }
  0x34   :  { %1629 = vmatmul.mubr.bf16.vlgmr.msra.gmra.mrb[0].mxu0 %v1820_v28 }
  0x35   :  { %1632 = vmatprep.mubr.bf16.mxu0 %v1821_v29  ;;  %479 = vperm.xlu1 %1810, %v457_v39  }
  0x36   :  { %474 = vperm.xlu0 %1809, %v456_v38  }
  0x39   :  { %489 = vperm.xlu1 %1810, %v459_v43  }
  0x3a   :  { %484 = vperm.xlu0 %1809, %v458_v42  }
  0x3c   :  { %1633 = vmatmul.mubr.bf16.gmra.mrb[4].mxu0 %v1822_v34 }
  0x3d   :  { %1636 = vmatprep.mubr.bf16.mxu0 %v1823_v35  ;;  %499 = vperm.xlu1 %1810, %v461_v45  }
  0x3e   :  { %494 = vperm.xlu0 %1809, %v460_v44  }
  0x41   :  { %509 = vperm.xlu1 %1810, %v463_v48  }
  0x42   :  { %504 = vperm.xlu0 %1809, %v462_v47  }
  0x44   :  { %1637 = vmatmul.mubr.bf16.gmra.mrb[8].mxu0 %v1824_v40 }
  0x45   :  { %1640 = vmatprep.mubr.bf16.mxu0 %v1825_v41  ;;  %519 = vperm.xlu1 %1810, %v465_v50  }
  0x46   :  { %514 = vperm.xlu0 %1809, %v464_v49  }
  0x49   :  { %529 = vperm.xlu1 %1810, %v467_v52  }
  0x4a   :  { %524 = vperm.xlu0 %1809, %v466_v51  }
  0x4c   :  { %1641 = vmatmul.mubr.bf16.gmra.mrb[12].mxu0 %v1826_v46 }
  0x4d   :  { %539 = vperm.xlu1 %1810, %v469_v54  }
  0x4e   :  { %534 = vperm.xlu0 %1809, %v468_v53  }
  0x51   :  { %549 = vperm.xlu1 %1810, %v471_v56  }
  0x52   :  { %544 = vperm.xlu0 %1809, %v470_v55  }
  0x94   :  { %v156_v59 = vpop.permute.xlu1 %155 }
  0x95   :  { %v146_v58 = vpop.permute.xlu0 %145 }
  0x98   :  { %v161_v61 = vpop.permute.xlu1 %160 }
  0x99   :  { %v151_v60 = vpop.permute.xlu0 %150 }
  0x9c   :  { %v171_v63 = vpop.permute.xlu1 %170 }
  0x9d   :  { %v166_v62 = vpop.permute.xlu0 %165 }
  0xa0   :  { %v181_v12 = vpop.permute.xlu1 %180 }
  0xa1   :  { %v176_v8 = vpop.permute.xlu0 %175 }
  0xa4   :  { %v191_v24 = vpop.permute.xlu1 %190 }
  0xa5   :  { %v186_v20 = vpop.permute.xlu0 %185 }
  0xa8   :  { %v201_v37 = vpop.permute.xlu1 %200 }
  0xa9   :  { %v196_v33 = vpop.permute.xlu0 %195 }
  0xac   :  { %v211_v50 = vpop.permute.xlu1 %210 }
  0xad   :  { %v206_v45 = vpop.permute.xlu0 %205 }
  0xb1   :  { %v216_v57 = vpop.permute.xlu0 %215 }
 0x107   :  { %v1630_v9 = vpop.f32.mrb[0].mxu0 }
 0x108   :  { %v362_v10 = vadd.f32 %v1630_v9, %v156_v59  ;;  %v353_v11 = vpop.f32.mrb[1].mxu0 }
 0x109   :  { %v354_v13 = vadd.f32 %v353_v11, %v146_v58  ;;  %v1631_v14 = vpop.f32.mrb[2].mxu0 }
 0x10a   :  { %v365_v15 = vadd.f32 %v1631_v14, %v161_v61  ;;  %v356_v16 = vpop.f32.mrb[3].mxu0  ;;  %v418_v18 = vmax.f32 %v362_v10, 0.0 }
 0x10b   :  { %v357_v17 = vadd.f32 %v356_v16, %v151_v60  ;;  %v416_v21 = vmax.f32 %v354_v13, 0.0 }
 0x10c   :  { %v419_v19 = vmax.f32 %v365_v15, 0.0 }
 0x10d   :  { %v417_v22 = vmax.f32 %v357_v17, 0.0 }
 0x10e   :  { %v449_v23 = vpack.c.bf16 %v419_v19, %v418_v18  ;;  %v1828_v18 = vld [vmem:[%s2257_s4 + $0x8] sm:$0xff]   ;;  %v1829_v19 = vld [vmem:[%s2257_s4 + $0x10] sm:$0xff]  }
 0x10f   :  { %v1634_v25 = vpop.f32.mrb[4].mxu0  ;;  %v448_v26 = vpack.c.bf16 %v417_v22, %v416_v21  ;;  %v1831_v21 = vld [vmem:[%s2257_s4 + $0x20] sm:$0xff]   ;;  %v1832_v22 = vld [vmem:[%s2257_s4 + $0x28] sm:$0xff]  }
 0x110   :  { %v378_v27 = vadd.f32 %v1634_v25, %v176_v8  ;;  %v369_v28 = vpop.f32.mrb[5].mxu0  ;;  %v475_v25 = vpop.permute.xlu0 %474 }
 0x111   :  { %v370_v29 = vadd.f32 %v369_v28, %v166_v62  ;;  %v1635_v30 = vpop.f32.mrb[6].mxu0  ;;  %1644 = vmatprep.subr.bf16.mxu1 %v448_v26  ;;  %v221_v62 = vpop.permute.xlu1 %220 }
 0x112   :  { %v381_v31 = vadd.f32 %v1635_v30, %v181_v12  ;;  %v372_v32 = vpop.f32.mrb[7].mxu0  ;;  %1645 = vmatpush3.bf16.msra.mxu1 %v448_v26  ;;  %v422_v35 = vmax.f32 %v378_v27, 0.0 }
 0x113   :  { %v373_v34 = vadd.f32 %v372_v32, %v171_v63  ;;  %1646 = vmatprep.subr.bf16.mxu1 %v449_v23  ;;  %v420_v38 = vmax.f32 %v370_v29, 0.0 }
 0x114   :  { %v423_v36 = vmax.f32 %v381_v31, 0.0  ;;  %v485_v27 = vpop.permute.xlu0 %484 }
 0x115   :  { %v421_v39 = vmax.f32 %v373_v34, 0.0  ;;  %v480_v26 = vpop.permute.xlu1 %479 }
 0x116   :  { %v451_v40 = vpack.c.bf16 %v423_v36, %v422_v35  ;;  %1647 = vmatpush3.bf16.msra.mxu1 %v449_v23  ;;  %v1833_v23 = vld [vmem:[%s2257_s4 + $0x30] sm:$0xff]   ;;  %v698_v35 = vstv %s697_s26 }
 0x117   :  { %v450_v41 = vpack.c.bf16 %v421_v39, %v420_v38  ;;  %v1638_v42 = vpop.f32.mrb[8].mxu0 }
 0x118   :  { %v394_v43 = vadd.f32 %v1638_v42, %v196_v33  ;;  %v385_v44 = vpop.f32.mrb[9].mxu0  ;;  %v495_v29 = vpop.permute.xlu0 %494 }
 0x119   :  { %v386_v46 = vadd.f32 %v385_v44, %v186_v20  ;;  %v1639_v47 = vpop.f32.mrb[10].mxu0  ;;  %1648 = vmatprep.subr.bf16.mxu1 %v450_v41  ;;  %v1830_v20 = vld [vmem:[%s2257_s4 + $0x18] sm:$0xff]   ;;  %v490_v28 = vpop.permute.xlu1 %489 }
 0x11a   :  { %v397_v48 = vadd.f32 %v1639_v47, %v201_v37  ;;  %v388_v49 = vpop.f32.mrb[11].mxu0  ;;  %1649 = vmatpush3.bf16.msra.mxu1 %v450_v41  ;;  %v426_v52 = vmax.f32 %v394_v43, 0.0 }
 0x11b   :  { %v389_v51 = vadd.f32 %v388_v49, %v191_v24  ;;  %1650 = vmatprep.subr.bf16.mxu1 %v451_v40  ;;  %v424_v54 = vmax.f32 %v386_v46, 0.0  ;;  %v1834_v24 = vld [vmem:[%s2257_s4 + $0x38] sm:$0xff]  }
 0x11c   :  { %v427_v53 = vmax.f32 %v397_v48, 0.0  ;;  %v505_v31 = vpop.permute.xlu0 %504 }
 0x11d   :  { %v425_v55 = vmax.f32 %v389_v51, 0.0  ;;  %v500_v30 = vpop.permute.xlu1 %499 }
 0x11e   :  { %v453_v56 = vpack.c.bf16 %v427_v53, %v426_v52  ;;  %1651 = vmatpush3.bf16.msra.mxu1 %v451_v40 }
 0x11f   :  { %v452_v58 = vpack.c.bf16 %v425_v55, %v424_v54  ;;  %v1642_v59 = vpop.f32.mrb[12].mxu0 }
 0x120   :  { %v410_v60 = vadd.f32 %v1642_v59, %v216_v57  ;;  %v401_v61 = vpop.f32.mrb[13].mxu0  ;;  %v515_v43 = vpop.permute.xlu0 %514 }
 0x121   :  { %v402_v63 = vadd.f32 %v401_v61, %v206_v45  ;;  %v1643_v8 = vpop.f32.mrb[14].mxu0  ;;  %1652 = vmatprep.subr.bf16.mxu1 %v452_v58  ;;  %v510_v36 = vpop.permute.xlu1 %509 }
 0x122   :  { %v413_v9 = vadd.f32 %v1643_v8, %v221_v62  ;;  %v404_v10 = vpop.f32.mrb[15].mxu0  ;;  %1653 = vmatpush3.bf16.msra.mxu1 %v452_v58  ;;  %v430_v12 = vmax.f32 %v410_v60, 0.0 }
 0x123   :  { %v405_v11 = vadd.f32 %v404_v10, %v211_v50  ;;  %1654 = vmatprep.subr.bf16.mxu1 %v453_v56  ;;  %v428_v14 = vmax.f32 %v402_v63, 0.0 }
 0x124   :  { %v431_v13 = vmax.f32 %v413_v9, 0.0  ;;  %v525_v52 = vpop.permute.xlu0 %524 }
 0x125   :  { %v429_v15 = vmax.f32 %v405_v11, 0.0  ;;  %v520_v44 = vpop.permute.xlu1 %519 }
 0x126   :  { %v455_v16 = vpack.c.bf16 %v431_v13, %v430_v12  ;;  %1655 = vmatpush3.bf16.msra.mxu1 %v453_v56 }
 0x127   :  { %v454_v17 = vpack.c.bf16 %v429_v15, %v428_v14 }
 0x128   :  { %v535_v58 = vpop.permute.xlu0 %534 }
 0x129   :  { %1656 = vmatprep.subr.bf16.mxu1 %v454_v17  ;;  %v530_v54 = vpop.permute.xlu1 %529 }
 0x12a   :  { %1657 = vmatpush3.bf16.msra.mxu1 %v454_v17 }
 0x12b   :  { %1658 = vmatprep.subr.bf16.mxu1 %v455_v16 }
 0x12c   :  { %v545_v9 = vpop.permute.xlu0 %544 }
 0x12d   :  { %v540_v63 = vpop.permute.xlu1 %539 }
 0x12e   :  { %1659 = vmatpush3.bf16.msra.mxu1 %v455_v16 }
 0x131   :  { %1661 = vmatmul.mubr.bf16.vlgmr.msra.gmra.mrb[0].mxu1 %v1828_v18  ;;  %v550_v13 = vpop.permute.xlu1 %549 }
 0x132   :  { %1664 = vmatprep.mubr.bf16.mxu1 %v1829_v19 }
 0x139   :  { %1665 = vmatmul.mubr.bf16.gmra.mrb[4].mxu1 %v1830_v20 }
 0x13a   :  { %1668 = vmatprep.mubr.bf16.mxu1 %v1831_v21 }
 0x141   :  { %1669 = vmatmul.mubr.bf16.gmra.mrb[8].mxu1 %v1832_v22 }
 0x142   :  { %1672 = vmatprep.mubr.bf16.mxu1 %v1833_v23 }
 0x149   :  { %1673 = vmatmul.mubr.bf16.gmra.mrb[12].mxu1 %v1834_v24 }
 0x204   :  { %v1662_v32 = vpop.f32.mrb[0].mxu1 }
 0x205   :  { %v2137_v33 = vadd.f32 %v1662_v32, %v485_v27  ;;  %v634_v34 = vpop.f32.mrb[1].mxu1 }
 0x206   :  { %v635_v37 = vadd.f32 %v634_v34, %v475_v25  ;;  %v1663_v38 = vpop.f32.mrb[2].mxu1 }
 0x207   :  { %v2139_v39 = vadd.f32 %v1663_v38, %v490_v28  ;;  %v637_v40 = vpop.f32.mrb[3].mxu1 }
 0x208   :  { %v2141_v41 = vmul.f32 %v698_v35, %v635_v37  ;;  %v638_v42 = vadd.f32 %v637_v40, %v480_v26 }
 0x20a   :  { %v719_v19 = vpack.c.bf16 %v638_v42, %v635_v37 }
 0x20c   :  { %v1666_v45 = vpop.f32.mrb[4].mxu1 }
 0x20d   :  { %v2143_v46 = vadd.f32 %v1666_v45, %v505_v31  ;;  %v650_v47 = vpop.f32.mrb[5].mxu1 }
 0x20e   :  { %v2145_v48 = vadd.f32 %v650_v47, %v495_v29  ;;  %v1667_v49 = vpop.f32.mrb[6].mxu1 }
 0x20f   :  { %v2147_v50 = vadd.f32 %v1667_v49, %v510_v36  ;;  %v653_v51 = vpop.f32.mrb[7].mxu1 }
 0x210   :  { %v654_v53 = vadd.f32 %v653_v51, %v500_v30 }
 0x214   :  { %v1670_v55 = vpop.f32.mrb[8].mxu1 }
 0x215   :  { %v2149_v56 = vadd.f32 %v1670_v55, %v525_v52  ;;  %v666_v57 = vpop.f32.mrb[9].mxu1 }
 0x216   :  { %v2151_v59 = vadd.f32 %v666_v57, %v515_v43  ;;  %v1671_v60 = vpop.f32.mrb[10].mxu1 }
 0x217   :  { %v2153_v61 = vadd.f32 %v1671_v60, %v530_v54  ;;  %v669_v62 = vpop.f32.mrb[11].mxu1 }
 0x218   :  { %v670_v8 = vadd.f32 %v669_v62, %v520_v44 }
 0x21c   :  { %v1674_v10 = vpop.f32.mrb[12].mxu1 }
 0x21d   :  { %v2155_v11 = vadd.f32 %v1674_v10, %v545_v9  ;;  %v682_v12 = vpop.f32.mrb[13].mxu1 }
 0x21e   :  { %v683_v14 = vadd.f32 %v682_v12, %v535_v58  ;;  %v1675_v15 = vpop.f32.mrb[14].mxu1 }
 0x21f   :  { %v2157_v16 = vadd.f32 %v1675_v15, %v550_v13  ;;  %v685_v17 = vpop.f32.mrb[15].mxu1 }
 0x220   :  { %v686_v18 = vadd.f32 %v685_v17, %v540_v63 }
 0x221   :  { %1877 = dma.done.wait [#allocation3], 1024 }
 0x222   :  { %1878 = vsyncadd [#allocation3], 4294966272  ;;  %1677 = vmatpush3.bf16.msra.mxu0 %v1932_v0  ;;  %1692 = vmatprep.mubr.bf16.mxu0 %v719_v19  ;;  %v720_v20 = vpack.c.bf16 %v2139_v39, %v2137_v33  ;;  %v721_v21 = vpack.c.bf16 %v654_v53, %v2145_v48  ;;  %v722_v22 = vpack.c.bf16 %v2147_v50, %v2143_v46  ;;  %s1511_s4 = sld [smem:[#allocation4 + $0x1]]  ;;  %s1512_s2 = sld [smem:[#allocation4 + $0x2]] }
 0x223   :  { %1678 = vmatprep.subr.bf16.mxu0 %v1937_v1  ;;  %1708 = vmatprep.subr.bf16.mxu1 %v1932_v0  ;;  %v723_v23 = vpack.c.bf16 %v670_v8, %v2151_v59  ;;  %v724_v24 = vpack.c.bf16 %v2153_v61, %v2149_v56  ;;  %v725_v25 = vpack.c.bf16 %v686_v18, %v683_v14  ;;  %s1513_s6 = sld [smem:[#allocation4 + $0x3]]  ;;  %s1514_s27 = sld [smem:[#allocation4 + $0x4]] }
 0x224   :  { %1709 = vmatpush3.bf16.msra.mxu1 %v1932_v0  ;;  %v726_v26 = vpack.c.bf16 %v2157_v16, %v2155_v11  ;;  %s1883_s28 = smov [#allocation7]  }
 0x225   :  { %1710 = vmatprep.subr.bf16.mxu1 %v1937_v1  ;;  %s1461_s29 = sshll.u32 %s1883_s28, 4  ;;  %s2234_s29 = int_to_ptr.vmem [resolvable:$true] %s1461_s29 }
 0x226   :  { %1679 = vmatpush3.bf16.msra.mxu0 %v1937_v1  ;;  %s1853_s30 = scalar_lea.vmem %s2234_s29, 2048  ;;  %p1858_p6 = scmp.lt.s32.totalorder %s2234_s29, %s2234_s29 }
 0x227   :  { %1680 = vmatprep.subr.bf16.mxu0 %v1942_v2  ;;  %p1854_p5 = scmp.ne.s32.totalorder %s2234_s29, %s1853_s30  ;;  %p1859_p7 = scmp.lt.s32.totalorder %s1853_s30, %s1853_s30 }
 0x228   :  { %1711 = vmatpush3.bf16.msra.mxu1 %v1937_v1  ;;  %v972_v49 = vstv %s1512_s2 }
 0x229   :  { %1712 = vmatprep.subr.bf16.mxu1 %v1942_v2  ;;  %v1111_v17 = vstv %s1513_s6  ;;  %p1860_p8 = por %p1859_p7, %p1858_p6 }
 0x22a   :  { %1681 = vmatpush3.bf16.msra.mxu0 %v1942_v2 }
 0x22b   :  { %1682 = vmatprep.subr.bf16.mxu0 %v1947_v3  ;;  %p1861_p9 = pnand %p1860_p8, %p1854_p5 }
 0x22c   :  { %1713 = vmatpush3.bf16.msra.mxu1 %v1942_v2 }
 0x22d   :  { %1714 = vmatprep.subr.bf16.mxu1 %v1947_v3 }
 0x22e   :  { %1683 = vmatpush3.bf16.msra.mxu0 %v1947_v3 }
 0x22f   :  { %1684 = vmatprep.subr.bf16.mxu0 %v1952_v4 }
 0x230   :  { %1715 = vmatpush3.bf16.msra.mxu1 %v1947_v3 }
 0x231   :  { %1716 = vmatprep.subr.bf16.mxu1 %v1952_v4 }
 0x232   :  { %1685 = vmatpush3.bf16.msra.mxu0 %v1952_v4 }
 0x233   :  { %1686 = vmatprep.subr.bf16.mxu0 %v1957_v5 }
 0x234   :  { %1717 = vmatpush3.bf16.msra.mxu1 %v1952_v4 }
 0x235   :  { %1718 = vmatprep.subr.bf16.mxu1 %v1957_v5 }
 0x236   :  { %1687 = vmatpush3.bf16.msra.mxu0 %v1957_v5 }
 0x237   :  { %1688 = vmatprep.subr.bf16.mxu0 %v1962_v6 }
 0x238   :  { %1719 = vmatpush3.bf16.msra.mxu1 %v1957_v5 }
 0x239   :  { %1720 = vmatprep.subr.bf16.mxu1 %v1962_v6 }
 0x23a   :  { %1689 = vmatpush3.bf16.msra.mxu0 %v1962_v6 }
 0x23b   :  { %1690 = vmatprep.subr.bf16.mxu0 %v1967_v7 }
 0x23c   :  { %1721 = vmatpush3.bf16.msra.mxu1 %v1962_v6 }
 0x23d   :  { %1722 = vmatprep.subr.bf16.mxu1 %v1967_v7 }
 0x23e   :  { %1691 = vmatpush3.bf16.msra.mxu0 %v1967_v7 }
 0x23f   :  { %1740 = vmatprep.subr.bf16.mxu0 %v1932_v0 }
 0x240   :  { %1723 = vmatpush3.bf16.msra.mxu1 %v1967_v7 }
 0x241   :  { %1693 = vmatmul.mubr.bf16.vlgmr.msra.gmra.mrb[16].mxu0 %v720_v20  ;;  %1772 = vmatprep.subr.bf16.mxu1 %v1932_v0 }
 0x242   :  { %1696 = vmatprep.mubr.bf16.mxu0 %v721_v21  ;;  %1741 = vmatpush3.bf16.msra.mxu0 %v1932_v0 }
 0x243   :  { %1742 = vmatprep.subr.bf16.mxu0 %v1937_v1 }
 0x246   :  { %1743 = vmatpush3.bf16.msra.mxu0 %v1937_v1 }
 0x247   :  { %1744 = vmatprep.subr.bf16.mxu0 %v1942_v2 }
 0x249   :  { %1697 = vmatmul.mubr.bf16.gmra.mrb[20].mxu0 %v722_v22 }
 0x24a   :  { %1700 = vmatprep.mubr.bf16.mxu0 %v723_v23  ;;  %1745 = vmatpush3.bf16.msra.mxu0 %v1942_v2 }
 0x24b   :  { %1746 = vmatprep.subr.bf16.mxu0 %v1947_v3 }
 0x24e   :  { %1747 = vmatpush3.bf16.msra.mxu0 %v1947_v3 }
 0x24f   :  { %1748 = vmatprep.subr.bf16.mxu0 %v1952_v4 }
 0x251   :  { %1701 = vmatmul.mubr.bf16.gmra.mrb[24].mxu0 %v724_v24 }
 0x252   :  { %1704 = vmatprep.mubr.bf16.mxu0 %v725_v25  ;;  %1749 = vmatpush3.bf16.msra.mxu0 %v1952_v4 }
 0x253   :  { %1750 = vmatprep.subr.bf16.mxu0 %v1957_v5 }
 0x256   :  { %1751 = vmatpush3.bf16.msra.mxu0 %v1957_v5 }
 0x257   :  { %1752 = vmatprep.subr.bf16.mxu0 %v1962_v6 }
 0x259   :  { %1705 = vmatmul.mubr.bf16.gmra.mrb[28].mxu0 %v726_v26 }
 0x25a   :  { %1753 = vmatpush3.bf16.msra.mxu0 %v1962_v6 }
 0x25b   :  { %1754 = vmatprep.subr.bf16.mxu0 %v1967_v7 }
 0x25e   :  { %1755 = vmatpush3.bf16.msra.mxu0 %v1967_v7 }
 0x314   :  { %v1694_v27 = vpop.f32.mrb[16].mxu0 }
 0x315   :  { %v769_v28 = vpop.f32.mrb[17].mxu0 }
 0x316   :  { %v1695_v29 = vpop.f32.mrb[18].mxu0 }
 0x317   :  { %v867_v30 = vpack.c.bf16 %v1695_v29, %v1694_v27  ;;  %v772_v31 = vpop.f32.mrb[19].mxu0 }
 0x318   :  { %v866_v32 = vpack.c.bf16 %v772_v31, %v769_v28 }
 0x31a   :  { %1724 = vmatprep.mubr.bf16.mxu1 %v866_v32 }
 0x31b   :  { %1725 = vmatmul.mubr.bf16.vlgmr.msra.gmra.mrb[16].mxu1 %v867_v30 }
 0x31c   :  { %v1698_v33 = vpop.f32.mrb[20].mxu0  ;;  %1773 = vmatpush3.bf16.msra.mxu1 %v1932_v0 }
 0x31d   :  { %v785_v34 = vpop.f32.mrb[21].mxu0  ;;  %1774 = vmatprep.subr.bf16.mxu1 %v1937_v1 }
 0x31e   :  { %v1699_v35 = vpop.f32.mrb[22].mxu0 }
 0x31f   :  { %v869_v36 = vpack.c.bf16 %v1699_v35, %v1698_v33  ;;  %v788_v37 = vpop.f32.mrb[23].mxu0 }
 0x320   :  { %v868_v38 = vpack.c.bf16 %v788_v37, %v785_v34  ;;  %1775 = vmatpush3.bf16.msra.mxu1 %v1937_v1 }
 0x321   :  { %1776 = vmatprep.subr.bf16.mxu1 %v1942_v2 }
 0x322   :  { %1728 = vmatprep.mubr.bf16.mxu1 %v868_v38 }
 0x323   :  { %1729 = vmatmul.mubr.bf16.gmra.mrb[20].mxu1 %v869_v36 }
 0x324   :  { %v1702_v39 = vpop.f32.mrb[24].mxu0  ;;  %1777 = vmatpush3.bf16.msra.mxu1 %v1942_v2 }
 0x325   :  { %v801_v40 = vpop.f32.mrb[25].mxu0  ;;  %1778 = vmatprep.subr.bf16.mxu1 %v1947_v3 }
 0x326   :  { %v1703_v0 = vpop.f32.mrb[26].mxu0 }
 0x327   :  { %v871_v42 = vpack.c.bf16 %v1703_v0, %v1702_v39  ;;  %v804_v43 = vpop.f32.mrb[27].mxu0 }
 0x328   :  { %v870_v44 = vpack.c.bf16 %v804_v43, %v801_v40  ;;  %1779 = vmatpush3.bf16.msra.mxu1 %v1947_v3  ;;  %v833_v3 = vstv %s1511_s4 }
 0x329   :  { %1780 = vmatprep.subr.bf16.mxu1 %v1952_v4 }
 0x32a   :  { %1732 = vmatprep.mubr.bf16.mxu1 %v870_v44  ;;  %v1250_v44 = vstv %s1514_s27 }
 0x32b   :  { %1733 = vmatmul.mubr.bf16.gmra.mrb[24].mxu1 %v871_v42 }
 0x32c   :  { %v1706_v1 = vpop.f32.mrb[28].mxu0  ;;  %1781 = vmatpush3.bf16.msra.mxu1 %v1952_v4  ;;  %v834_v4 = vmul.f32 %v833_v3, %v769_v28 }
 0x32d   :  { %v817_v45 = vpop.f32.mrb[29].mxu0  ;;  %1782 = vmatprep.subr.bf16.mxu1 %v1957_v5 }
 0x32e   :  { %v1707_v2 = vpop.f32.mrb[30].mxu0  ;;  %v850_v52 = vadd.f32 %v834_v4, %v2141_v41 }
 0x32f   :  { %v873_v46 = vpack.c.bf16 %v1707_v2, %v1706_v1  ;;  %v820_v47 = vpop.f32.mrb[31].mxu0 }
 0x330   :  { %v872_v48 = vpack.c.bf16 %v820_v47, %v817_v45  ;;  %1783 = vmatpush3.bf16.msra.mxu1 %v1957_v5 }
 0x331   :  { %1784 = vmatprep.subr.bf16.mxu1 %v1962_v6 }
 0x332   :  { %1736 = vmatprep.mubr.bf16.mxu1 %v872_v48 }
 0x333   :  { %1737 = vmatmul.mubr.bf16.gmra.mrb[28].mxu1 %v873_v46 }
 0x334   :  { %1785 = vmatpush3.bf16.msra.mxu1 %v1962_v6 }
 0x335   :  { %1786 = vmatprep.subr.bf16.mxu1 %v1967_v7 }
 0x338   :  { %1787 = vmatpush3.bf16.msra.mxu1 %v1967_v7 }
 0x3ee   :  { %v1726_v50 = vpop.f32.mrb[16].mxu1 }
 0x3ef   :  { %v908_v51 = vpop.f32.mrb[17].mxu1 }
 0x3f0   :  { %v973_v5 = vmul.f32 %v972_v49, %v908_v51  ;;  %v1727_v53 = vpop.f32.mrb[18].mxu1 }
 0x3f1   :  { %v1006_v54 = vpack.c.bf16 %v1727_v53, %v1726_v50  ;;  %v911_v55 = vpop.f32.mrb[19].mxu1 }
 0x3f2   :  { %v989_v56 = vadd.f32 %v973_v5, %v850_v52  ;;  %v1005_v57 = vpack.c.bf16 %v911_v55, %v908_v51 }
 0x3f4   :  { %1756 = vmatprep.mubr.bf16.mxu0 %v1005_v57 }
 0x3f5   :  { %1757 = vmatmul.mubr.bf16.vlgmr.msra.gmra.mrb[32].mxu0 %v1006_v54 }
 0x3f6   :  { %v1730_v6 = vpop.f32.mrb[20].mxu1 }
 0x3f7   :  { %v924_v58 = vpop.f32.mrb[21].mxu1 }
 0x3f8   :  { %v1731_v7 = vpop.f32.mrb[22].mxu1 }
 0x3f9   :  { %v1008_v59 = vpack.c.bf16 %v1731_v7, %v1730_v6  ;;  %v927_v60 = vpop.f32.mrb[23].mxu1 }
 0x3fa   :  { %v1007_v61 = vpack.c.bf16 %v927_v60, %v924_v58 }
 0x3fc   :  { %1760 = vmatprep.mubr.bf16.mxu0 %v1007_v61 }
 0x3fd   :  { %1761 = vmatmul.mubr.bf16.gmra.mrb[36].mxu0 %v1008_v59 }
 0x3fe   :  { %v1734_v62 = vpop.f32.mrb[24].mxu1 }
 0x3ff   :  { %v940_v63 = vpop.f32.mrb[25].mxu1 }
 0x400   :  { %v1735_v8 = vpop.f32.mrb[26].mxu1 }
 0x401   :  { %v1010_v41 = vpack.c.bf16 %v1735_v8, %v1734_v62  ;;  %v943_v9 = vpop.f32.mrb[27].mxu1 }
 0x402   :  { %v1009_v10 = vpack.c.bf16 %v943_v9, %v940_v63 }
 0x404   :  { %1764 = vmatprep.mubr.bf16.mxu0 %v1009_v10 }
 0x405   :  { %1765 = vmatmul.mubr.bf16.gmra.mrb[40].mxu0 %v1010_v41 }
 0x406   :  { %v1738_v11 = vpop.f32.mrb[28].mxu1 }
 0x407   :  { %v956_v12 = vpop.f32.mrb[29].mxu1 }
 0x408   :  { %v1739_v13 = vpop.f32.mrb[30].mxu1 }
 0x409   :  { %v1012_v14 = vpack.c.bf16 %v1739_v13, %v1738_v11  ;;  %v959_v15 = vpop.f32.mrb[31].mxu1 }
 0x40a   :  { %v1011_v16 = vpack.c.bf16 %v959_v15, %v956_v12 }
 0x40c   :  { %1768 = vmatprep.mubr.bf16.mxu0 %v1011_v16 }
 0x40d   :  { %1769 = vmatmul.mubr.bf16.gmra.mrb[44].mxu0 %v1012_v14 }
 0x4c8   :  { %v1758_v18 = vpop.f32.mrb[32].mxu0 }
 0x4c9   :  { %v1047_v19 = vpop.f32.mrb[33].mxu0 }
 0x4ca   :  { %v1112_v20 = vmul.f32 %v1111_v17, %v1047_v19  ;;  %v1759_v21 = vpop.f32.mrb[34].mxu0 }
 0x4cb   :  { %v1145_v22 = vpack.c.bf16 %v1759_v21, %v1758_v18  ;;  %v1050_v23 = vpop.f32.mrb[35].mxu0 }
 0x4cc   :  { %v1128_v24 = vadd.f32 %v1112_v20, %v989_v56  ;;  %v1144_v25 = vpack.c.bf16 %v1050_v23, %v1047_v19 }
 0x4ce   :  { %1788 = vmatprep.mubr.bf16.mxu1 %v1144_v25 }
 0x4cf   :  { %1789 = vmatmul.mubr.bf16.vlgmr.msra.gmra.mrb[32].mxu1 %v1145_v22 }
 0x4d0   :  { %v1762_v26 = vpop.f32.mrb[36].mxu0 }
 0x4d1   :  { %v1063_v27 = vpop.f32.mrb[37].mxu0 }
 0x4d2   :  { %v1763_v28 = vpop.f32.mrb[38].mxu0 }
 0x4d3   :  { %v1147_v29 = vpack.c.bf16 %v1763_v28, %v1762_v26  ;;  %v1066_v30 = vpop.f32.mrb[39].mxu0 }
 0x4d4   :  { %v1146_v31 = vpack.c.bf16 %v1066_v30, %v1063_v27 }
 0x4d6   :  { %1792 = vmatprep.mubr.bf16.mxu1 %v1146_v31 }
 0x4d7   :  { %1793 = vmatmul.mubr.bf16.gmra.mrb[36].mxu1 %v1147_v29 }
 0x4d8   :  { %v1766_v32 = vpop.f32.mrb[40].mxu0 }
 0x4d9   :  { %v1079_v33 = vpop.f32.mrb[41].mxu0 }
 0x4da   :  { %v1767_v34 = vpop.f32.mrb[42].mxu0 }
 0x4db   :  { %v1149_v35 = vpack.c.bf16 %v1767_v34, %v1766_v32  ;;  %v1082_v36 = vpop.f32.mrb[43].mxu0 }
 0x4dc   :  { %v1148_v37 = vpack.c.bf16 %v1082_v36, %v1079_v33 }
 0x4de   :  { %1796 = vmatprep.mubr.bf16.mxu1 %v1148_v37 }
 0x4df   :  { %1797 = vmatmul.mubr.bf16.gmra.mrb[40].mxu1 %v1149_v35 }
 0x4e0   :  { %v1770_v38 = vpop.f32.mrb[44].mxu0 }
 0x4e1   :  { %v1095_v39 = vpop.f32.mrb[45].mxu0 }
 0x4e2   :  { %v1771_v40 = vpop.f32.mrb[46].mxu0 }
 0x4e3   :  { %v1151_v0 = vpack.c.bf16 %v1771_v40, %v1770_v38  ;;  %v1098_v42 = vpop.f32.mrb[47].mxu0 }
 0x4e4   :  { %v1150_v43 = vpack.c.bf16 %v1098_v42, %v1095_v39 }
 0x4e6   :  { %1800 = vmatprep.mubr.bf16.mxu1 %v1150_v43 }
 0x4e7   :  { %1801 = vmatmul.mubr.bf16.gmra.mrb[44].mxu1 %v1151_v0 }
 0x5a2   :  { %v1790_v1 = vpop.f32.mrb[32].mxu1 }
 0x5a3   :  { %v1186_v45 = vpop.f32.mrb[33].mxu1 }
 0x5a4   :  { %v1251_v2 = vmul.f32 %v1250_v44, %v1186_v45  ;;  %v1791_v46 = vpop.f32.mrb[34].mxu1 }
 0x5a5   :  { %v1189_v47 = vpop.f32.mrb[35].mxu1 }
 0x5a6   :  { %v1267_v48 = vadd.f32 %v1251_v2, %v1128_v24 }
 0x5a8   :  { %v1332_v3 = vmax.f32 %v1267_v48, -1e+30 }
 0x5aa   :  { %v1336_v4 = vmax.f32 %v1332_v3, -1e+30  ;;  %v1794_v49 = vpop.f32.mrb[36].mxu1 }
 0x5ab   :  { %v1202_v50 = vpop.f32.mrb[37].mxu1 }
 0x5ac   :  { %v1340_v51 = vmax.f32 %v1336_v4, -1e+30  ;;  %v1795_v52 = vpop.f32.mrb[38].mxu1 }
 0x5ad   :  { %v1205_v5 = vpop.f32.mrb[39].mxu1 }
 0x5ae   :  { %v1344_v53 = vmax.f32 %v1340_v51, -1e+30 }
 0x5b0   :  { %v1346_v54 = vmax.f32 %v1344_v53, -1e+30 }
 0x5b2   :  { %v1347_v55 = vrot.slane %v1346_v54, 4  ;;  %v1798_v56 = vpop.f32.mrb[40].mxu1 }
 0x5b3   :  { %v1218_v57 = vpop.f32.mrb[41].mxu1 }
 0x5b4   :  { %v1348_v6 = vmax.f32 %v1346_v54, %v1347_v55  ;;  %v1799_v58 = vpop.f32.mrb[42].mxu1 }
 0x5b5   :  { %v1221_v7 = vpop.f32.mrb[43].mxu1 }
 0x5b6   :  { %v1349_v59 = vrot.slane %v1348_v6, 2 }
 0x5b8   :  { %v1350_v60 = vmax.f32 %v1348_v6, %v1349_v59 }
 0x5ba   :  { %v1351_v61 = vrot.slane %v1350_v60, 1  ;;  %v1802_v62 = vpop.f32.mrb[44].mxu1 }
 0x5bb   :  { %v1234_v63 = vpop.f32.mrb[45].mxu1 }
 0x5bc   :  { %v1352_v8 = vmax.f32 %v1350_v60, %v1351_v61  ;;  %v1803_v41 = vpop.f32.mrb[46].mxu1 }
 0x5bd   :  { %v1237_v9 = vpop.f32.mrb[47].mxu1 }
 0x5be   :  { %v1353_v10 = vsub.f32 %v1267_v48, %v1352_v8  ;;  %v1354_v11 = vsub.f32 -1e+30, %v1352_v8 }
 0x5c0   :  { %v1369_v12 = vmul.f32 1.442695, %v1353_v10  ;;  %v1371_v13 = vmul.f32 1.442695, %v1354_v11 }
 0x5c2   :  { %1835 = vpow2.f32 %v1369_v12 }
 0x5c3   :  { %1837 = vpow2.f32 %v1371_v13 }
 0x5cc   :  { %v1836_v14 = vpop.eup %1835 }
 0x5cd   :  { %v1838_v15 = vpop.eup %1837 }
 0x5ce   :  { %v1401_v16 = vadd.f32 %v1838_v15, %v1836_v14 }
 0x5d0   :  { %v1402_v17 = vadd.f32 %v1838_v15, %v1401_v16 }
 0x5d2   :  { %v1403_v18 = vadd.f32 %v1838_v15, %v1402_v17 }
 0x5d4   :  { %v1404_v19 = vadd.f32 %v1838_v15, %v1403_v18 }
 0x5d6   :  { %v1405_v20 = vadd.f32 %v1838_v15, %v1404_v19 }
 0x5d8   :  { %v1406_v21 = vadd.f32 %v1838_v15, %v1405_v20 }
 0x5da   :  { %v1407_v22 = vadd.f32 %v1838_v15, %v1406_v21 }
 0x5dc   :  { %v1408_v23 = vadd.f32 %v1838_v15, %v1407_v22 }
 0x5de   :  { %v1409_v24 = vadd.f32 %v1838_v15, %v1408_v23 }
 0x5e0   :  { %v1410_v25 = vadd.f32 %v1838_v15, %v1409_v24 }
 0x5e2   :  { %v1411_v26 = vadd.f32 %v1838_v15, %v1410_v25 }
 0x5e4   :  { %v1412_v27 = vadd.f32 %v1838_v15, %v1411_v26 }
 0x5e6   :  { %v1413_v28 = vadd.f32 %v1838_v15, %v1412_v27 }
 0x5e8   :  { %v1414_v29 = vadd.f32 %v1838_v15, %v1413_v28 }
 0x5ea   :  { %v1415_v30 = vadd.f32 %v1838_v15, %v1414_v29 }
 0x5ec   :  { %v1416_v31 = vrot.slane %v1415_v30, 4 }
 0x5ee   :  { %v1417_v32 = vadd.f32 %v1416_v31, %v1415_v30 }
 0x5f0   :  { %v1418_v33 = vrot.slane %v1417_v32, 2 }
 0x5f2   :  { %v1419_v34 = vadd.f32 %v1418_v33, %v1417_v32 }
 0x5f4   :  { %v1420_v35 = vrot.slane %v1419_v34, 1 }
 0x5f6   :  { %v1421_v36 = vadd.f32 %v1420_v35, %v1419_v34 }
 0x5f8   :  { %1839 = vlog2.f32 %v1421_v36 }
 0x602   :  { %v1840_v37 = vpop.eup %1839 }
 0x603   :  { %v1423_v38 = vmul.f32 0.6931472, %v1840_v37 }
 0x605   :  { %v1424_v39 = vsub.f32 %v1353_v10, %v1423_v38  ;;  %v1425_v40 = vsub.f32 %v1354_v11, %v1423_v38 }
 0x607   :  { %1440 = vst [vmem:[#allocation7] sm:$0xff] %v1424_v39  ;;  %1441 = vst [vmem:[#allocation7 + $0x8] sm:$0xff] %v1425_v40 }
 0x608   :  { %1442 = vst [vmem:[#allocation7 + $0x10] sm:$0xff] %v1425_v40  ;;  %1443 = vst [vmem:[#allocation7 + $0x18] sm:$0xff] %v1425_v40 }
 0x609   :  { %1444 = vst [vmem:[#allocation7 + $0x20] sm:$0xff] %v1425_v40  ;;  %1445 = vst [vmem:[#allocation7 + $0x28] sm:$0xff] %v1425_v40 }
 0x60a   :  { %1446 = vst [vmem:[#allocation7 + $0x30] sm:$0xff] %v1425_v40  ;;  %1447 = vst [vmem:[#allocation7 + $0x38] sm:$0xff] %v1425_v40 }
 0x60b   :  { %1448 = vst [vmem:[#allocation7 + $0x40] sm:$0xff] %v1425_v40  ;;  %1449 = vst [vmem:[#allocation7 + $0x48] sm:$0xff] %v1425_v40 }
 0x60c   :  { %1450 = vst [vmem:[#allocation7 + $0x50] sm:$0xff] %v1425_v40  ;;  %1451 = vst [vmem:[#allocation7 + $0x58] sm:$0xff] %v1425_v40 }
 0x60d   :  { %1452 = vst [vmem:[#allocation7 + $0x60] sm:$0xff] %v1425_v40  ;;  %1453 = vst [vmem:[#allocation7 + $0x68] sm:$0xff] %v1425_v40 }
 0x60e   :  { %1454 = vst [vmem:[#allocation7 + $0x70] sm:$0xff] %v1425_v40  ;;  %1455 = vst [vmem:[#allocation7 + $0x78] sm:$0xff] %v1425_v40 }
 0x60f   :  { %1864 = shalt.err (!%p1861_p9)
}
 0x610   :  { %s1865_s9 = scalar_lea.hbm %s2260_s7, 2048 }
 0x611   :  { %p1866_p10 = scmp.ne.s32.totalorder %s2260_s7, %s1865_s9  ;;  %p1869_p11 = scmp.lt.u32.totalorder %s1865_s9, %s2260_s7 }
 0x613   :  { %p1871_p12 = pnand %p1869_p11, %p1866_p10 }
 0x615   :  { %1874 = shalt.err (!%p1871_p12)
}
 0x616   :  { %s1884_s12 = smov 128   ;;  %s1885_s5 = smov 8  }
 0x617   :  { %1467 = dma.vmem_to_hbm [thread:$0]  %s2234_s29, 2048, %s2260_s7, [#allocation5], %s1884_s12, %s1884_s12, %s1885_s5  }
 0x618   :  { %1879 = dma.done.wait [#allocation5], 2048  }
 0x619   :  { %1880 = vsyncadd [#allocation5], 4294965248 }
 0x61a   :  { %1471 = vsyncpa [#allocation5], 1 }
 0x61b   :  { %1472 = vsyncpa [#allocation6], 1 }
 0x61c   :  { %1473 = vsyncmov [#allocation3] }
 0x61f   :  { %s1474_s15 = vpop.sfrf %1473 }
 0x620   :  { %p1515_p13 = scmp.ne.s32.totalorder %s1474_s15, 0 }
 0x622   :  { %1478 = shalt.err (%p1515_p13)  }

</bundles_post_ra>
